<compile_context>
chip_gen: v6e
topology: v6e:2x2x1
jax: 0.10.0
libtpu: 0.0.40
codegen_flags: <defaults>
</compile_context>

<pallas_src>
import functools

import jax
import jax.numpy as jnp
from jax.experimental import pallas as pl
from jax.experimental.pallas import tpu as pltpu


# Output-column layout of the padded layer-3 weight (lane-dense (tb,128) tile).
_Q1_COL = 0
_Q2_COL = 64
_QPAD = 128
_ROW_ALIGN = 32     # batch-tile row alignment (covers f32 & bf16 sublane packing)


# ----------------------------------------------------------------------------
# helpers
# ----------------------------------------------------------------------------
def _round_up(x, m):
    return (x + m - 1) // m * m


def _block_diag(a, b):
    ra, ca = a.shape
    rb, cb = b.shape
    top = jnp.concatenate([a, jnp.zeros((ra, cb), a.dtype)], axis=1)
    bot = jnp.concatenate([jnp.zeros((rb, ca), b.dtype), b], axis=1)
    return jnp.concatenate([top, bot], axis=0)


def _tensorcores_per_chip():
    """v7x has 2 TensorCores per chip -> want >=2 grid steps so the
    ("parallel",) batch axis can shard across them.  v5e/v6e: 1 big tile."""
    try:
        kind = (jax.devices()[0].device_kind or "").lower()
    except Exception:
        return 1
    return 2 if "v7" in kind else 1


# ----------------------------------------------------------------------------
# kernel
# ----------------------------------------------------------------------------
def _critic_kernel(leakiness, sa_ref,
                   w1_ref, b1_ref,
                   w2_ref, b2_ref,
                   w3_ref, b3_ref,
                   q_ref):
    """One batch tile; both critic towers fused via block-diagonal weights.

    sa_ref : (tb, S+A)        [state | action], compute dtype
    w1_ref : (S+A, 2*fc1)     [w1 | w4]
    w2_ref : (2*fc1, 2*fc2)   block_diag(w2, w5)
    w3_ref : (2*fc2, 128)     w3 in column 0, w6 in column 64, rest zero
    q_ref  : (tb, 128) f32    q1 = col 0, q2 = col 64
    """

    def lrelu(x):
        # leakiness == 0 degenerates to plain ReLU, matching the torch branch.
        return jnp.where(x > 0, x, leakiness * x)

    # Layer 1 — single K=(S+A) dot on the concatenated input stream.
    h = (jnp.dot(sa_ref[...], w1_ref[...], preferred_element_type=jnp.float32)
         + b1_ref[...])                                   # (tb, 2*fc1) f32
    h = lrelu(h).astype(w2_ref.dtype)

    # Layer 2 — [h1|h2] @ block_diag(w2, w5).
    h = jnp.dot(h, w2_ref[...], preferred_element_type=jnp.float32) + b2_ref[...]
    h = lrelu(h).astype(w3_ref.dtype)                     # (tb, 2*fc2)

    # Layer 3 — padded N=128 so the output store is lane-dense (unmasked vst).
    q = jnp.dot(h, w3_ref[...], preferred_element_type=jnp.float32) + b3_ref[...]
    q_ref[...] = q.astype(q_ref.dtype)


# ----------------------------------------------------------------------------
# parameter packing (do once, not per call)
# ----------------------------------------------------------------------------
def pack_critic_params(params, compute_dtype=jnp.bfloat16):
    """Fuse the twin towers into wide / block-diagonal weights."""
    fc2 = params["w3"].shape[0]
    w3p = jnp.zeros((2 * fc2, _QPAD), jnp.float32)
    w3p = w3p.at[:fc2, _Q1_COL].set(params["w3"][:, 0])
    w3p = w3p.at[fc2:, _Q2_COL].set(params["w6"][:, 0])
    b3p = jnp.zeros((1, _QPAD), jnp.float32)
    b3p = b3p.at[0, _Q1_COL].set(params["b3"][0, 0])
    b3p = b3p.at[0, _Q2_COL].set(params["b6"][0, 0])
    return {
        "w1c": jnp.concatenate([params["w1"], params["w4"]], axis=1).astype(compute_dtype),
        "b1c": jnp.concatenate([params["b1"], params["b4"]], axis=1).astype(jnp.float32),
        "w2b": _block_diag(params["w2"], params["w5"]).astype(compute_dtype),
        "b2c": jnp.concatenate([params["b2"], params["b5"]], axis=1).astype(jnp.float32),
        "w3p": w3p.astype(compute_dtype),
        "b3p": b3p,
    }


# ----------------------------------------------------------------------------
# wrapper
# ----------------------------------------------------------------------------
def critic_forward(state, action, params, *, leakiness=0.01,
                   compute_dtype=jnp.bfloat16, block_b=4096):
    """Pallas equivalent of Critic.forward(state, action) -> (q1, q2)."""
    if "w1c" not in params:                       # accept raw per-layer params too
        params = pack_critic_params(params, compute_dtype)

    B, S = state.shape
    A = action.shape[1]

    # --- batch tile / grid sizing -------------------------------------------
    # Step overhead (~0.35us) dominates at small tiles, and per-tile VMEM
    # footprint is sub-MiB even at tb=4096, so pick the fewest, biggest tiles
    # that (a) respect block_b and (b) give >=2 steps on dual-TC chips (v7x).
    n_cores = _tensorcores_per_chip()
    cap = max(_ROW_ALIGN, _round_up(int(block_b), _ROW_ALIGN))
    min_steps = pl.cdiv(B, cap)
    want_steps = n_cores if B >= 2 * _ROW_ALIGN else 1
    n_steps = max(min_steps, want_steps)
    tb = _round_up(pl.cdiv(B, n_steps), _ROW_ALIGN)
    b_pad = _round_up(B, tb)
    grid = (b_pad // tb,)

    # --- operands -------------------------------------------------------------
    sa = jnp.concatenate([state, action], axis=1)          # (B, S+A)
    if b_pad != B:
        sa = jnp.pad(sa, ((0, b_pad - B), (0, 0)))
    sa = sa.astype(compute_dtype)

    w1c = params["w1c"].astype(compute_dtype)
    b1c = params["b1c"].astype(jnp.float32)
    w2b = params["w2b"].astype(compute_dtype)
    b2c = params["b2c"].astype(jnp.float32)
    w3p = params["w3p"].astype(compute_dtype)
    b3p = params["b3p"].astype(jnp.float32)

    h1f = w1c.shape[1]      # 2 * fc1_units
    h2f = w2b.shape[1]      # 2 * fc2_units

    def resident(x):        # full-array block, constant index -> stays in VMEM
        return pl.BlockSpec(x.shape, lambda i: (0, 0))

    in_specs = ([pl.BlockSpec((tb, S + A), lambda i: (i, 0))]
                + [resident(x) for x in (w1c, b1c, w2b, b2c, w3p, b3p)])
    out_specs = pl.BlockSpec((tb, _QPAD), lambda i: (i, 0))
    out_shape = jax.ShapeDtypeStruct((b_pad, _QPAD), jnp.float32)

    itemsize = jnp.dtype(compute_dtype).itemsize
    flops = 2 * b_pad * ((S + A) * h1f + h1f * h2f + h2f * _QPAD)
    bytes_accessed = (b_pad * (S + A) * itemsize
                      + (w1c.size + w2b.size + w3p.size) * itemsize
                      + (b1c.size + b2c.size + b3p.size) * 4
                      + b_pad * _QPAD * 4)

    q = pl.pallas_call(
        functools.partial(_critic_kernel, leakiness),
        out_shape=out_shape,
        grid=grid,
        in_specs=in_specs,
        out_specs=out_specs,
        compiler_params=pltpu.CompilerParams(
            dimension_semantics=("parallel",),
            vmem_limit_bytes=32 << 20),
        cost_estimate=pl.CostEstimate(
            flops=int(flops), transcendentals=0,
            bytes_accessed=int(bytes_accessed)),
    )(sa, w1c, b1c, w2b, b2c, w3p, b3p)

    return q[:B, _Q1_COL:_Q1_COL + 1], q[:B, _Q2_COL:_Q2_COL + 1]


# ----------------------------------------------------------------------------
# parameter init (mirrors Critic.reset_parameters) & pure-JAX reference
# ----------------------------------------------------------------------------
def init_critic_params(key, state_size, action_size, fc1_units, fc2_units):
    """hidden_init() in the reference uses weight.size()[0] == out_features as
    "fan_in"; we reproduce that exactly. Weights are stored transposed (in, out).
    Biases use torch.nn.Linear's default uniform(-1/sqrt(in), 1/sqrt(in))."""
    in_dim = state_size + action_size
    dims = [
        ("w1", "b1", in_dim, fc1_units, 1.0 / jnp.sqrt(fc1_units)),
        ("w2", "b2", fc1_units, fc2_units, 1.0 / jnp.sqrt(fc2_units)),
        ("w3", "b3", fc2_units, 1, 0.003),
        ("w4", "b4", in_dim, fc1_units, 1.0 / jnp.sqrt(fc1_units)),
        ("w5", "b5", fc1_units, fc2_units, 1.0 / jnp.sqrt(fc2_units)),
        ("w6", "b6", fc2_units, 1, 0.003),
    ]
    params = {}
    for wname, bname, fin, fout, lim in dims:
        key, kw, kb = jax.random.split(key, 3)
        params[wname] = jax.random.uniform(
            kw, (fin, fout), jnp.float32, minval=-lim, maxval=lim)
        blim = 1.0 / jnp.sqrt(fin)
        params[bname] = jax.random.uniform(
            kb, (1, fout), jnp.float32, minval=-blim, maxval=blim)
    return params


def _critic_reference(state, action, params, leakiness=0.01):
    sa = jnp.concatenate([state, action], axis=1)

    def lrelu(x):
        return jnp.where(x > 0, x, leakiness * x)

    h1 = lrelu(sa @ params["w1"] + params["b1"])
    h1 = lrelu(h1 @ params["w2"] + params["b2"])
    q1 = h1 @ params["w3"] + params["b3"]
    h2 = lrelu(sa @ params["w4"] + params["b4"])
    h2 = lrelu(h2 @ params["w5"] + params["b5"])
    q2 = h2 @ params["w6"] + params["b6"]
    return q1, q2


# ----------------------------------------------------------------------------
# main
# ----------------------------------------------------------------------------
if __name__ == "__main__":
    batch = 80            # deliberately NOT a multiple of the batch tile alignment
    state_size = 24
    action_size = 8
    fc1_units = 64        # fused hidden widths: 128 / 64 lanes
    fc2_units = 32
    leakiness = 0.01

    key = jax.random.PRNGKey(0)
    kp, ks, ka = jax.random.split(key, 3)
    params = init_critic_params(kp, state_size, action_size, fc1_units, fc2_units)
    state = jax.random.normal(ks, (batch, state_size), jnp.float32)
    action = jax.random.normal(ka, (batch, action_size), jnp.float32)

    q1_ref, q2_ref = _critic_reference(state, action, params, leakiness)

    # --- f32 compute path, default (big-tile) grid: tight tolerance ---
    q1, q2 = critic_forward(state, action, params,
                            leakiness=leakiness, compute_dtype=jnp.float32)
    q1 = jax.block_until_ready(q1)
    q2 = jax.block_until_ready(q2)
    assert q1.shape == (batch, 1) and q2.shape == (batch, 1)
    assert jnp.allclose(q1, q1_ref, atol=1e-4, rtol=1e-4)
    assert jnp.allclose(q2, q2_ref, atol=1e-4, rtol=1e-4)

    # --- f32 compute path, forced multi-step grid (exercises padding/pipeline) ---
    q1m, q2m = critic_forward(state, action, params,
                              leakiness=leakiness, compute_dtype=jnp.float32,
                              block_b=32)
    q1m = jax.block_until_ready(q1m)
    q2m = jax.block_until_ready(q2m)
    assert jnp.allclose(q1m, q1_ref, atol=1e-4, rtol=1e-4)
    assert jnp.allclose(q2m, q2_ref, atol=1e-4, rtol=1e-4)

    # --- default bf16 compute path (f32 accumulation / bias / lrelu), loose tol ---
    packed_bf16 = pack_critic_params(params, jnp.bfloat16)
    q1b, q2b = critic_forward(state, action, packed_bf16,
                              leakiness=leakiness)   # compute_dtype defaults to bf16
    q1b = jax.block_until_ready(q1b)
    q2b = jax.block_until_ready(q2b)
    assert jnp.allclose(q1b, q1_ref, atol=3e-2, rtol=3e-2)
    assert jnp.allclose(q2b, q2_ref, atol=3e-2, rtol=3e-2)

    print("KERNEL_OK")
</pallas_src>

<mosaic_0001>
module attributes {stable_mosaic.version = 11 : i64} {
  func.func @_critic_kernel(%arg0: i32, %arg1: memref<96x32xf32, #tpu.memory_space<vmem>>, %arg2: memref<32x128xf32, #tpu.memory_space<vmem>>, %arg3: memref<1x128xf32, #tpu.memory_space<vmem>>, %arg4: memref<128x64xf32, #tpu.memory_space<vmem>>, %arg5: memref<1x64xf32, #tpu.memory_space<vmem>>, %arg6: memref<64x128xf32, #tpu.memory_space<vmem>>, %arg7: memref<1x128xf32, #tpu.memory_space<vmem>>, %arg8: memref<96x128xf32, #tpu.memory_space<vmem>>) attributes {dimension_semantics = [#tpu.dimension_semantics<parallel>], iteration_bounds = array<i64: 1>, scalar_prefetch = 0 : i64, scratch_operands = 0 : i64, tpu.core_type = #tpu.core_type<tc>, window_params = [{transform_indices = @transform_0, window_bounds = array<i64: 96, 32>}, {pipeline_mode = #tpu.pipeline_mode<synchronous>, transform_indices = @transform_1, window_bounds = array<i64: 32, 128>}, {pipeline_mode = #tpu.pipeline_mode<synchronous>, transform_indices = @transform_2, window_bounds = array<i64: 1, 128>}, {pipeline_mode = #tpu.pipeline_mode<synchronous>, transform_indices = @transform_3, window_bounds = array<i64: 128, 64>}, {pipeline_mode = #tpu.pipeline_mode<synchronous>, transform_indices = @transform_4, window_bounds = array<i64: 1, 64>}, {pipeline_mode = #tpu.pipeline_mode<synchronous>, transform_indices = @transform_5, window_bounds = array<i64: 64, 128>}, {pipeline_mode = #tpu.pipeline_mode<synchronous>, transform_indices = @transform_6, window_bounds = array<i64: 1, 128>}, {transform_indices = @transform_7, window_bounds = array<i64: 96, 128>}]} {
    %c0 = arith.constant 0 : index
    %c0_0 = arith.constant 0 : index
    %0 = vector.load %arg1[%c0, %c0_0] : memref<96x32xf32, #tpu.memory_space<vmem>>, vector<96x32xf32>
    %c0_1 = arith.constant 0 : index
    %c0_2 = arith.constant 0 : index
    %1 = vector.load %arg2[%c0_1, %c0_2] : memref<32x128xf32, #tpu.memory_space<vmem>>, vector<32x128xf32>
    %cst = arith.constant dense<0.000000e+00> : vector<96x128xf32>
    %2 = tpu.matmul %0, %1, %cst {dimension_numbers = #tpu.dot_dimension_numbers<[1], [0], [0], [1], [0, 0, 1, 1], [], []>} : vector<96x32xf32>, vector<32x128xf32>, vector<96x128xf32> -> vector<96x128xf32>
    %c0_3 = arith.constant 0 : index
    %c0_4 = arith.constant 0 : index
    %3 = vector.load %arg3[%c0_3, %c0_4] : memref<1x128xf32, #tpu.memory_space<vmem>>, vector<1x128xf32>
    %4 = vector.broadcast %3 : vector<1x128xf32> to vector<96x128xf32>
    %5 = arith.addf %2, %4 : vector<96x128xf32>
    %cst_5 = arith.constant 0.000000e+00 : f32
    %6 = vector.broadcast %cst_5 : f32 to vector<96x128xf32>
    %7 = arith.cmpf ogt, %5, %6 : vector<96x128xf32>
    %cst_6 = arith.constant 0.00999999977 : f32
    %8 = vector.broadcast %cst_6 : f32 to vector<96x128xf32>
    %9 = arith.mulf %8, %5 : vector<96x128xf32>
    %10 = arith.select %7, %5, %9 : vector<96x128xi1>, vector<96x128xf32>
    %c0_7 = arith.constant 0 : index
    %c0_8 = arith.constant 0 : index
    %11 = vector.load %arg4[%c0_7, %c0_8] : memref<128x64xf32, #tpu.memory_space<vmem>>, vector<128x64xf32>
    %cst_9 = arith.constant dense<0.000000e+00> : vector<96x64xf32>
    %12 = tpu.matmul %10, %11, %cst_9 {dimension_numbers = #tpu.dot_dimension_numbers<[1], [0], [0], [1], [0, 0, 1, 1], [], []>} : vector<96x128xf32>, vector<128x64xf32>, vector<96x64xf32> -> vector<96x64xf32>
    %c0_10 = arith.constant 0 : index
    %c0_11 = arith.constant 0 : index
    %13 = vector.load %arg5[%c0_10, %c0_11] : memref<1x64xf32, #tpu.memory_space<vmem>>, vector<1x64xf32>
    %14 = vector.broadcast %13 : vector<1x64xf32> to vector<96x64xf32>
    %15 = arith.addf %12, %14 : vector<96x64xf32>
    %cst_12 = arith.constant 0.000000e+00 : f32
    %16 = vector.broadcast %cst_12 : f32 to vector<96x64xf32>
    %17 = arith.cmpf ogt, %15, %16 : vector<96x64xf32>
    %cst_13 = arith.constant 0.00999999977 : f32
    %18 = vector.broadcast %cst_13 : f32 to vector<96x64xf32>
    %19 = arith.mulf %18, %15 : vector<96x64xf32>
    %20 = arith.select %17, %15, %19 : vector<96x64xi1>, vector<96x64xf32>
    %c0_14 = arith.constant 0 : index
    %c0_15 = arith.constant 0 : index
    %21 = vector.load %arg6[%c0_14, %c0_15] : memref<64x128xf32, #tpu.memory_space<vmem>>, vector<64x128xf32>
    %cst_16 = arith.constant dense<0.000000e+00> : vector<96x128xf32>
    %22 = tpu.matmul %20, %21, %cst_16 {dimension_numbers = #tpu.dot_dimension_numbers<[1], [0], [0], [1], [0, 0, 1, 1], [], []>} : vector<96x64xf32>, vector<64x128xf32>, vector<96x128xf32> -> vector<96x128xf32>
    %c0_17 = arith.constant 0 : index
    %c0_18 = arith.constant 0 : index
    %23 = vector.load %arg7[%c0_17, %c0_18] : memref<1x128xf32, #tpu.memory_space<vmem>>, vector<1x128xf32>
    %24 = vector.broadcast %23 : vector<1x128xf32> to vector<96x128xf32>
    %25 = arith.addf %22, %24 : vector<96x128xf32>
    %c0_19 = arith.constant 0 : index
    %c0_20 = arith.constant 0 : index
    %26 = vector.load %arg8[%c0_19, %c0_20] : memref<96x128xf32, #tpu.memory_space<vmem>>, vector<96x128xf32>
    tpu.vector_store %arg8[%c0_19, %c0_20], %25 {strides = array<i32>} : memref<96x128xf32, #tpu.memory_space<vmem>>, vector<96x128xf32>,
    return
  }
  func.func @transform_0(%arg0: i32) -> (i32, i32) {
    %c0_i32 = arith.constant 0 : i32
    %c0_i32_0 = arith.constant 0 : i32
    return %arg0, %c0_i32 : i32, i32
  }
  func.func @transform_1(%arg0: i32) -> (i32, i32) {
    %c0_i32 = arith.constant 0 : i32
    %c0_i32_0 = arith.constant 0 : i32
    %c0_i32_1 = arith.constant 0 : i32
    return %c0_i32, %c0_i32_0 : i32, i32
  }
  func.func @transform_2(%arg0: i32) -> (i32, i32) {
    %c0_i32 = arith.constant 0 : i32
    %c0_i32_0 = arith.constant 0 : i32
    %c0_i32_1 = arith.constant 0 : i32
    return %c0_i32, %c0_i32_0 : i32, i32
  }
  func.func @transform_3(%arg0: i32) -> (i32, i32) {
    %c0_i32 = arith.constant 0 : i32
    %c0_i32_0 = arith.constant 0 : i32
    %c0_i32_1 = arith.constant 0 : i32
    return %c0_i32, %c0_i32_0 : i32, i32
  }
  func.func @transform_4(%arg0: i32) -> (i32, i32) {
    %c0_i32 = arith.constant 0 : i32
    %c0_i32_0 = arith.constant 0 : i32
    %c0_i32_1 = arith.constant 0 : i32
    return %c0_i32, %c0_i32_0 : i32, i32
  }
  func.func @transform_5(%arg0: i32) -> (i32, i32) {
    %c0_i32 = arith.constant 0 : i32
    %c0_i32_0 = arith.constant 0 : i32
    %c0_i32_1 = arith.constant 0 : i32
    return %c0_i32, %c0_i32_0 : i32, i32
  }
  func.func @transform_6(%arg0: i32) -> (i32, i32) {
    %c0_i32 = arith.constant 0 : i32
    %c0_i32_0 = arith.constant 0 : i32
    %c0_i32_1 = arith.constant 0 : i32
    return %c0_i32, %c0_i32_0 : i32, i32
  }
  func.func @transform_7(%arg0: i32) -> (i32, i32) {
    %c0_i32 = arith.constant 0 : i32
    %c0_i32_0 = arith.constant 0 : i32
    return %arg0, %c0_i32 : i32, i32
  }
}

</mosaic_0001>

<bundles_post_ra>
// kernel: tpu_custom_call.1
= control target key start
LH: loop header
LB: loop body
LE: loop exit
PB: predicated region body
PF: predicated region fallthrough
CT: control target
= control target key end

     0   :  { %vm50_vm0 = vcmask 261120   ;;  %s1062_s0 = inlined_call_operand.vmem [shape: f32[96,32], index: 0, kind: input, shape index: {}]   ;;  %s1063_s1 = inlined_call_operand.vmem [shape: f32[32,128], index: 1, kind: input, shape index: {}]   ;;  %s1064_s2 = inlined_call_operand.vmem [shape: f32[1,128], index: 2, kind: input, shape index: {}]   ;;  %s1065_s3 = inlined_call_operand.vmem [shape: f32[128,64], index: 3, kind: input, shape index: {}]   ;;  %s1066_s4 = inlined_call_operand.vmem [shape: f32[1,64], index: 4, kind: input, shape index: {}]   ;;  %s1067_s5 = inlined_call_operand.vmem [shape: f32[64,128], index: 5, kind: input, shape index: {}]   ;;  %s1068_s6 = inlined_call_operand.vmem [shape: f32[1,128], index: 6, kind: input, shape index: {}]   ;;  %s1069_s7 = inlined_call_operand.hbm [shape: f32[96,128], index: 7, kind: output, shape index: {}]  }
   0x1   :  { %v42_v0 = vld [vmem:[%s1063_s1 + $0x18] sm:$0xff]  ;;  %v41_v1 = vld [vmem:[%s1063_s1 + $0x10] sm:$0xff]  ;;  %v27_v2 = vld [vmem:[%s1062_s0] sm:$0xff] }
   0x2   :  { %728 = vmatprep.subr.mxu0 %v42_v0  ;;  %v40_v3 = vld [vmem:[%s1063_s1 + $0x8] sm:$0xff]  ;;  %736 = vmatprep.mubr.msk.f32.mxu0 %vm50_vm0, %v27_v2  ;;  %v39_v4 = vld [vmem:[%s1063_s1] sm:$0xff]  ;;  %v263_v5 = vld [vmem:[%s1065_s3 + $0x78] sm:$0xff] }
   0x3   :  { %729 = vmatpush3.msra.mxu0 %v42_v0  ;;  %v262_v6 = vld [vmem:[%s1065_s3 + $0x70] sm:$0xff]  ;;  %v28_v7 = vld [vmem:[%s1062_s0 + $0x8] sm:$0xff]  ;;  %754 = vmatprep.subr.mxu1 %v263_v5  ;;  %v260_v10 = vld [vmem:[%s1065_s3 + $0x60] sm:$0xff] }
   0x4   :  { %730 = vmatprep.subr.mxu0 %v41_v1  ;;  %v29_v8 = vld [vmem:[%s1062_s0 + $0x10] sm:$0xff]  ;;  %755 = vmatpush3.msra.mxu1 %v263_v5  ;;  %v261_v9 = vld [vmem:[%s1065_s3 + $0x68] sm:$0xff] }
   0x5   :  { %731 = vmatpush3.msra.mxu0 %v41_v1  ;;  %756 = vmatprep.subr.mxu1 %v262_v6 }
   0x6   :  { %732 = vmatprep.subr.mxu0 %v40_v3  ;;  %757 = vmatpush3.msra.mxu1 %v262_v6 }
   0x7   :  { %733 = vmatpush3.msra.mxu0 %v40_v3 }
   0x8   :  { %734 = vmatprep.subr.mxu0 %v39_v4 }
   0x9   :  { %735 = vmatpush3.msra.mxu0 %v39_v4 }
   0xa   :  { %737 = vmatmul.mubr.msk.f32.vlgmr.msra.gmra.mxu0 %vm50_vm0, %v28_v7 }
   0xb   :  { %12 = vsyncpa [#allocation3], 0  ;;  %739 = vmatprep.mubr.msk.f32.mxu0 %vm50_vm0, %v29_v8  ;;  %v30_v11 = vld [vmem:[%s1062_s0 + $0x18] sm:$0xff]  ;;  %758 = vmatprep.subr.mxu1 %v261_v9  ;;  %v31_v12 = vld [vmem:[%s1062_s0 + $0x20] sm:$0xff]  ;;  %vm447_vm13 = vcmask 523264  }
   0xc   :  { %759 = vmatpush3.msra.mxu1 %v261_v9  ;;  %v259_v13 = vld [vmem:[%s1065_s3 + $0x58] sm:$0xff]  ;;  %v258_v14 = vld [vmem:[%s1065_s3 + $0x50] sm:$0xff]  ;;  %v32_v15 = vld [vmem:[%s1062_s0 + $0x28] sm:$0xff] }
   0xd   :  { %760 = vmatprep.subr.mxu1 %v260_v10  ;;  %v33_v16 = vld [vmem:[%s1062_s0 + $0x30] sm:$0xff]  ;;  %v257_v17 = vld [vmem:[%s1065_s3 + $0x48] sm:$0xff]  ;;  %v256_v18 = vld [vmem:[%s1065_s3 + $0x40] sm:$0xff] }
   0xe   :  { %740 = vmatmul.mubr.msk.f32.gmra.mxu0 %vm50_vm0, %v30_v11  ;;  %761 = vmatpush3.msra.mxu1 %v260_v10  ;;  %v34_v19 = vld [vmem:[%s1062_s0 + $0x38] sm:$0xff]  ;;  %v35_v20 = vld [vmem:[%s1062_s0 + $0x40] sm:$0xff]  ;;  %v254_v22 = vld [vmem:[%s1065_s3 + $0x30] sm:$0xff] }
   0xf   :  { %742 = vmatprep.mubr.msk.f32.mxu0 %vm50_vm0, %v31_v12  ;;  %762 = vmatprep.subr.mxu1 %v259_v13  ;;  %v255_v21 = vld [vmem:[%s1065_s3 + $0x38] sm:$0xff]  ;;  %v36_v23 = vld [vmem:[%s1062_s0 + $0x48] sm:$0xff]  ;;  %v37_v24 = vld [vmem:[%s1062_s0 + $0x50] sm:$0xff] }
  0x10   :  { %763 = vmatpush3.msra.mxu1 %v259_v13  ;;  %v253_v25 = vld [vmem:[%s1065_s3 + $0x28] sm:$0xff]  ;;  %v252_v26 = vld [vmem:[%s1065_s3 + $0x20] sm:$0xff]  ;;  %v38_v27 = vld [vmem:[%s1062_s0 + $0x58] sm:$0xff] }
  0x11   :  { %764 = vmatprep.subr.mxu1 %v258_v14  ;;  %v251_v28 = vld [vmem:[%s1065_s3 + $0x18] sm:$0xff]  ;;  %v250_v29 = vld [vmem:[%s1065_s3 + $0x10] sm:$0xff]  ;;  %v249_v30 = vld [vmem:[%s1065_s3 + $0x8] sm:$0xff] }
  0x12   :  { %743 = vmatmul.mubr.msk.f32.gmra.mxu0 %vm50_vm0, %v32_v15  ;;  %765 = vmatpush3.msra.mxu1 %v258_v14  ;;  %v248_v31 = vld [vmem:[%s1065_s3] sm:$0xff]  ;;  %v439_v32 = vld [vmem:[%s1067_s5 + $0x38] sm:$0xff]  ;;  %v438_v33 = vld [vmem:[%s1067_s5 + $0x30] sm:$0xff] }
  0x13   :  { %745 = vmatprep.mubr.msk.f32.mxu0 %vm50_vm0, %v33_v16  ;;  %766 = vmatprep.subr.mxu1 %v257_v17  ;;  %v437_v34 = vld [vmem:[%s1067_s5 + $0x28] sm:$0xff]  ;;  %v436_v35 = vld [vmem:[%s1067_s5 + $0x20] sm:$0xff]  ;;  %v435_v36 = vld [vmem:[%s1067_s5 + $0x18] sm:$0xff] }
  0x14   :  { %767 = vmatpush3.msra.mxu1 %v257_v17  ;;  %804 = vmatprep.subr.mxu0 %v439_v32  ;;  %v434_v37 = vld [vmem:[%s1067_s5 + $0x10] sm:$0xff]  ;;  %v637_v38 = vld [vmem:[%s1064_s2] ss:$0 sm:$0xff] }
  0x15   :  { %768 = vmatprep.subr.mxu1 %v256_v18  ;;  %805 = vmatpush3.msra.mxu0 %v439_v32 }
  0x16   :  { %746 = vmatmul.mubr.msk.f32.gmra.mxu0 %vm50_vm0, %v34_v19  ;;  %769 = vmatpush3.msra.mxu1 %v256_v18 }
  0x17   :  { %748 = vmatprep.mubr.msk.f32.mxu0 %vm50_vm0, %v35_v20  ;;  %770 = vmatprep.subr.mxu1 %v255_v21 }
  0x18   :  { %771 = vmatpush3.msra.mxu1 %v255_v21  ;;  %806 = vmatprep.subr.mxu0 %v438_v33 }
  0x19   :  { %772 = vmatprep.subr.mxu1 %v254_v22  ;;  %807 = vmatpush3.msra.mxu0 %v438_v33 }
  0x1a   :  { %749 = vmatmul.mubr.msk.f32.gmra.mxu0 %vm50_vm0, %v36_v23  ;;  %773 = vmatpush3.msra.mxu1 %v254_v22  ;;  %v433_v23 = vld [vmem:[%s1067_s5 + $0x8] sm:$0xff] }
  0x1b   :  { %751 = vmatprep.mubr.msk.f32.mxu0 %vm50_vm0, %v37_v24  ;;  %774 = vmatprep.subr.mxu1 %v253_v25  ;;  %v432_v24 = vld [vmem:[%s1067_s5] sm:$0xff] }
  0x1c   :  { %775 = vmatpush3.msra.mxu1 %v253_v25  ;;  %808 = vmatprep.subr.mxu0 %v437_v34  ;;  %v650_v25 = vld [vmem:[%s1066_s4] ss:$0 sm:$0xff] }
  0x1d   :  { %776 = vmatprep.subr.mxu1 %v252_v26  ;;  %809 = vmatpush3.msra.mxu0 %v437_v34 }
  0x1e   :  { %752 = vmatmul.mubr.msk.f32.gmra.mxu0 %vm50_vm0, %v38_v27  ;;  %777 = vmatpush3.msra.mxu1 %v252_v26 }
  0x1f   :  { %778 = vmatprep.subr.mxu1 %v251_v28  ;;  %810 = vmatprep.subr.mxu0 %v436_v35 }
  0x20   :  { %779 = vmatpush3.msra.mxu1 %v251_v28  ;;  %811 = vmatpush3.msra.mxu0 %v436_v35 }
  0x21   :  { %780 = vmatprep.subr.mxu1 %v250_v29  ;;  %812 = vmatprep.subr.mxu0 %v435_v36 }
  0x22   :  { %781 = vmatpush3.msra.mxu1 %v250_v29  ;;  %813 = vmatpush3.msra.mxu0 %v435_v36 }
  0x23   :  { %782 = vmatprep.subr.mxu1 %v249_v30  ;;  %814 = vmatprep.subr.mxu0 %v434_v37 }
  0x24   :  { %783 = vmatpush3.msra.mxu1 %v249_v30  ;;  %815 = vmatpush3.msra.mxu0 %v434_v37 }
  0x25   :  { %784 = vmatprep.subr.mxu1 %v248_v31  ;;  %816 = vmatprep.subr.mxu0 %v433_v23 }
  0x26   :  { %785 = vmatpush3.msra.mxu1 %v248_v31  ;;  %817 = vmatpush3.msra.mxu0 %v433_v23 }
  0x27   :  { %818 = vmatprep.subr.mxu0 %v432_v24 }
  0x28   :  { %819 = vmatpush3.msra.mxu0 %v432_v24 }
  0xca   :  { %v738_v39 = vpop.f32.mrf.mxu0 }
  0xcb   :  { %v159_v40 = vadd.f32 %v738_v39, %v637_v38 }
  0xcc   :  { %v153_v41 = vpop.f32.mrf.mxu0 }
  0xcd   :  { %v154_v42 = vadd.f32 %v637_v38, %v153_v41  ;;  %v225_v43 = vmul.f32 0.01, %v159_v40  ;;  %vm213_vm2 = vcmp.gt.f32.partialorder %v159_v40, 0.0 }
  0xce   :  { %v741_v44 = vpop.f32.mrf.mxu0 }
  0xcf   :  { %v169_v45 = vadd.f32 %v741_v44, %v637_v38  ;;  %vm212_vm1 = vcmp.gt.f32.partialorder %v154_v42, 0.0  ;;  %v224_v46 = vmul.f32 0.01, %v154_v42  ;;  %v237_v52 = vsel %vm213_vm2, %v159_v40, %v225_v43 }
  0xd0   :  { %v163_v47 = vpop.f32.mrf.mxu0 }
  0xd1   :  { %v164_v48 = vadd.f32 %v637_v38, %v163_v47  ;;  %v236_v49 = vsel %vm212_vm1, %v154_v42, %v224_v46  ;;  %v227_v50 = vmul.f32 0.01, %v169_v45  ;;  %vm215_vm4 = vcmp.gt.f32.partialorder %v169_v45, 0.0 }
  0xd2   :  { %v744_v51 = vpop.f32.mrf.mxu0  ;;  %786 = vmatprep.mubr.f32.mxu1 %v236_v49 }
  0xd3   :  { %v226_v53 = vmul.f32 0.01, %v164_v48  ;;  %v179_v54 = vadd.f32 %v744_v51, %v637_v38  ;;  %787 = vmatmul.mubr.f32.vlgmr.msra.gmra.mxu1 %v237_v52  ;;  %vm214_vm3 = vcmp.gt.f32.partialorder %v164_v48, 0.0  ;;  %v239_v60 = vsel %vm215_vm4, %v169_v45, %v227_v50 }
  0xd4   :  { %v173_v55 = vpop.f32.mrf.mxu0 }
  0xd5   :  { %v174_v56 = vadd.f32 %v637_v38, %v173_v55  ;;  %v238_v57 = vsel %vm214_vm3, %v164_v48, %v226_v53  ;;  %v229_v58 = vmul.f32 0.01, %v179_v54  ;;  %vm217_vm6 = vcmp.gt.f32.partialorder %v179_v54, 0.0 }
  0xd6   :  { %v747_v59 = vpop.f32.mrf.mxu0  ;;  %789 = vmatprep.mubr.f32.mxu1 %v238_v57 }
  0xd7   :  { %v228_v61 = vmul.f32 0.01, %v174_v56  ;;  %v189_v62 = vadd.f32 %v747_v59, %v637_v38  ;;  %790 = vmatmul.mubr.f32.gmra.mxu1 %v239_v60  ;;  %vm216_vm5 = vcmp.gt.f32.partialorder %v174_v56, 0.0  ;;  %v241_v4 = vsel %vm217_vm6, %v179_v54, %v229_v58 }
  0xd8   :  { %v183_v63 = vpop.f32.mrf.mxu0 }
  0xd9   :  { %v184_v0 = vadd.f32 %v637_v38, %v183_v63  ;;  %v240_v1 = vsel %vm216_vm5, %v174_v56, %v228_v61  ;;  %v231_v2 = vmul.f32 0.01, %v189_v62  ;;  %vm219_vm8 = vcmp.gt.f32.partialorder %v189_v62, 0.0 }
  0xda   :  { %v750_v3 = vpop.f32.mrf.mxu0  ;;  %792 = vmatprep.mubr.f32.mxu1 %v240_v1 }
  0xdb   :  { %v230_v5 = vmul.f32 0.01, %v184_v0  ;;  %v199_v6 = vadd.f32 %v750_v3, %v637_v38  ;;  %793 = vmatmul.mubr.f32.gmra.mxu1 %v241_v4  ;;  %vm218_vm7 = vcmp.gt.f32.partialorder %v184_v0, 0.0  ;;  %v243_v12 = vsel %vm219_vm8, %v189_v62, %v231_v2 }
  0xdc   :  { %v193_v7 = vpop.f32.mrf.mxu0 }
  0xdd   :  { %v194_v8 = vadd.f32 %v637_v38, %v193_v7  ;;  %v242_v9 = vsel %vm218_vm7, %v184_v0, %v230_v5  ;;  %v233_v10 = vmul.f32 0.01, %v199_v6  ;;  %vm221_vm10 = vcmp.gt.f32.partialorder %v199_v6, 0.0 }
  0xde   :  { %v753_v11 = vpop.f32.mrf.mxu0  ;;  %795 = vmatprep.mubr.f32.mxu1 %v242_v9 }
  0xdf   :  { %v232_v13 = vmul.f32 0.01, %v194_v8  ;;  %v209_v14 = vadd.f32 %v753_v11, %v637_v38  ;;  %796 = vmatmul.mubr.f32.gmra.mxu1 %v243_v12  ;;  %vm220_vm9 = vcmp.gt.f32.partialorder %v194_v8, 0.0  ;;  %v245_v19 = vsel %vm221_vm10, %v199_v6, %v233_v10  ;;  %v651_v10 = vld [vmem:[%s1068_s6] ss:$0 sm:$0xff]  ;;  %s863_s6 = smov [#allocation2]  }
  0xe0   :  { %v203_v15 = vpop.f32.mrf.mxu0  ;;  %s626_s10 = sshll.u32 %s863_s6, 4  ;;  %s627_s10 = int_to_ptr.vmem [resolvable:$true] %s626_s10 }
  0xe1   :  { %v204_v16 = vadd.f32 %v637_v38, %v203_v15  ;;  %v244_v17 = vsel %vm220_vm9, %v194_v8, %v232_v13  ;;  %v235_v18 = vmul.f32 0.01, %v209_v14  ;;  %vm223_vm12 = vcmp.gt.f32.partialorder %v209_v14, 0.0  ;;  %s841_s11 = scalar_lea.vmem %s627_s10, 1536  ;;  %p846_p1 = scmp.lt.s32.totalorder %s627_s10, %s627_s10 }
  0xe2   :  { %798 = vmatprep.mubr.f32.mxu1 %v244_v17  ;;  %p842_p0 = scmp.ne.s32.totalorder %s627_s10, %s841_s11  ;;  %p847_p2 = scmp.lt.s32.totalorder %s841_s11, %s841_s11 }
  0xe3   :  { %v234_v20 = vmul.f32 0.01, %v204_v16  ;;  %799 = vmatmul.mubr.f32.gmra.mxu1 %v245_v19  ;;  %vm222_vm11 = vcmp.gt.f32.partialorder %v204_v16, 0.0  ;;  %v247_v22 = vsel %vm223_vm12, %v209_v14, %v235_v18 }
  0xe4   :  { %p848_p3 = por %p847_p2, %p846_p1 }
  0xe5   :  { %v246_v21 = vsel %vm222_vm11, %v204_v16, %v234_v20 }
  0xe6   :  { %801 = vmatprep.mubr.f32.mxu1 %v246_v21  ;;  %p849_p4 = pnand %p848_p3, %p842_p0 }
  0xe7   :  { %802 = vmatmul.mubr.f32.gmra.mxu1 %v247_v22 }
 0x193   :  { %v788_v26 = vpop.f32.mrf.mxu1 }
 0x194   :  { %v343_v27 = vadd.f32 %v788_v26, %v650_v25 }
 0x195   :  { %v337_v28 = vpop.f32.mrf.mxu1 }
 0x196   :  { %v338_v29 = vadd.f32 %v650_v25, %v337_v28  ;;  %v409_v30 = vmul.f32 0.01, %v343_v27  ;;  %vm397_vm14 = vcmp.gt.f32.partialorder %v343_v27, 0.0 }
 0x197   :  { %v791_v31 = vpop.f32.mrf.mxu1 }
 0x198   :  { %vm396_vm15 = vcmp.gt.f32.partialorder %v338_v29, 0.0  ;;  %v408_v32 = vmul.f32 0.01, %v338_v29  ;;  %v353_v33 = vadd.f32 %v791_v31, %v650_v25  ;;  %v421_v37 = vsel %vm397_vm14, %v343_v27, %v409_v30 }
 0x199   :  { %v347_v34 = vpop.f32.mrf.mxu1 }
 0x19a   :  { %v348_v35 = vadd.f32 %v650_v25, %v347_v34  ;;  %v420_v36 = vsel %vm396_vm15, %v338_v29, %v408_v32  ;;  %v411_v38 = vmul.f32 0.01, %v353_v33  ;;  %vm399_vm0 = vcmp.gt.f32.partialorder %v353_v33, 0.0 }
 0x19b   :  { %v794_v39 = vpop.f32.mrf.mxu1  ;;  %820 = vmatprep.mubr.msk.f32.mxu0 %vm447_vm13, %v420_v36 }
 0x19c   :  { %vm398_vm1 = vcmp.gt.f32.partialorder %v348_v35, 0.0  ;;  %v410_v40 = vmul.f32 0.01, %v348_v35  ;;  %v363_v41 = vadd.f32 %v794_v39, %v650_v25  ;;  %821 = vmatmul.mubr.msk.f32.vlgmr.msra.gmra.mxu0 %vm447_vm13, %v421_v37  ;;  %v423_v47 = vsel %vm399_vm0, %v353_v33, %v411_v38 }
 0x19d   :  { %v357_v42 = vpop.f32.mrf.mxu1 }
 0x19e   :  { %v358_v43 = vadd.f32 %v650_v25, %v357_v42  ;;  %v422_v44 = vsel %vm398_vm1, %v348_v35, %v410_v40  ;;  %v413_v45 = vmul.f32 0.01, %v363_v41  ;;  %vm401_vm2 = vcmp.gt.f32.partialorder %v363_v41, 0.0 }
 0x19f   :  { %v797_v46 = vpop.f32.mrf.mxu1  ;;  %823 = vmatprep.mubr.msk.f32.mxu0 %vm447_vm13, %v422_v44 }
 0x1a0   :  { %vm400_vm3 = vcmp.gt.f32.partialorder %v358_v43, 0.0  ;;  %v412_v48 = vmul.f32 0.01, %v358_v43  ;;  %v373_v49 = vadd.f32 %v797_v46, %v650_v25  ;;  %824 = vmatmul.mubr.msk.f32.gmra.mxu0 %vm447_vm13, %v423_v47  ;;  %v425_v55 = vsel %vm401_vm2, %v363_v41, %v413_v45 }
 0x1a1   :  { %v367_v50 = vpop.f32.mrf.mxu1 }
 0x1a2   :  { %v368_v51 = vadd.f32 %v650_v25, %v367_v50  ;;  %v424_v52 = vsel %vm400_vm3, %v358_v43, %v412_v48  ;;  %v415_v53 = vmul.f32 0.01, %v373_v49  ;;  %vm403_vm4 = vcmp.gt.f32.partialorder %v373_v49, 0.0 }
 0x1a3   :  { %v800_v54 = vpop.f32.mrf.mxu1  ;;  %826 = vmatprep.mubr.msk.f32.mxu0 %vm447_vm13, %v424_v52 }
 0x1a4   :  { %vm402_vm5 = vcmp.gt.f32.partialorder %v368_v51, 0.0  ;;  %v414_v56 = vmul.f32 0.01, %v368_v51  ;;  %v383_v57 = vadd.f32 %v800_v54, %v650_v25  ;;  %827 = vmatmul.mubr.msk.f32.gmra.mxu0 %vm447_vm13, %v425_v55  ;;  %v427_v63 = vsel %vm403_vm4, %v373_v49, %v415_v53 }
 0x1a5   :  { %v377_v58 = vpop.f32.mrf.mxu1 }
 0x1a6   :  { %v378_v59 = vadd.f32 %v650_v25, %v377_v58  ;;  %v426_v60 = vsel %vm402_vm5, %v368_v51, %v414_v56  ;;  %v417_v61 = vmul.f32 0.01, %v383_v57  ;;  %vm405_vm6 = vcmp.gt.f32.partialorder %v383_v57, 0.0 }
 0x1a7   :  { %v803_v62 = vpop.f32.mrf.mxu1  ;;  %829 = vmatprep.mubr.msk.f32.mxu0 %vm447_vm13, %v426_v60 }
 0x1a8   :  { %vm404_vm7 = vcmp.gt.f32.partialorder %v378_v59, 0.0  ;;  %v416_v0 = vmul.f32 0.01, %v378_v59  ;;  %v393_v1 = vadd.f32 %v803_v62, %v650_v25  ;;  %830 = vmatmul.mubr.msk.f32.gmra.mxu0 %vm447_vm13, %v427_v63  ;;  %v429_v6 = vsel %vm405_vm6, %v383_v57, %v417_v61 }
 0x1a9   :  { %v387_v2 = vpop.f32.mrf.mxu1 }
 0x1aa   :  { %v388_v3 = vadd.f32 %v650_v25, %v387_v2  ;;  %v428_v4 = vsel %vm404_vm7, %v378_v59, %v416_v0  ;;  %v419_v5 = vmul.f32 0.01, %v393_v1  ;;  %vm407_vm8 = vcmp.gt.f32.partialorder %v393_v1, 0.0 }
 0x1ab   :  { %832 = vmatprep.mubr.msk.f32.mxu0 %vm447_vm13, %v428_v4 }
 0x1ac   :  { %vm406_vm9 = vcmp.gt.f32.partialorder %v388_v3, 0.0  ;;  %v418_v7 = vmul.f32 0.01, %v388_v3  ;;  %833 = vmatmul.mubr.msk.f32.gmra.mxu0 %vm447_vm13, %v429_v6  ;;  %v431_v9 = vsel %vm407_vm8, %v393_v1, %v419_v5 }
 0x1ae   :  { %v430_v8 = vsel %vm406_vm9, %v388_v3, %v418_v7 }
 0x1af   :  { %835 = vmatprep.mubr.msk.f32.mxu0 %vm447_vm13, %v430_v8 }
 0x1b0   :  { %836 = vmatmul.mubr.msk.f32.gmra.mxu0 %vm447_vm13, %v431_v9 }
 0x25c   :  { %v822_v11 = vpop.f32.mrf.mxu0 }
 0x25d   :  { %v556_v12 = vadd.f32 %v822_v11, %v651_v10 }
 0x25e   :  { %v550_v13 = vpop.f32.mrf.mxu0 }
 0x25f   :  { %610 = vst [vmem:[#allocation2 + $0x8] sm:$0xff] %v556_v12  ;;  %v551_v14 = vadd.f32 %v651_v10, %v550_v13 }
 0x260   :  { %v825_v15 = vpop.f32.mrf.mxu0 }
 0x261   :  { %609 = vst [vmem:[#allocation2] sm:$0xff] %v551_v14  ;;  %v566_v16 = vadd.f32 %v825_v15, %v651_v10 }
 0x262   :  { %v560_v17 = vpop.f32.mrf.mxu0 }
 0x263   :  { %612 = vst [vmem:[#allocation2 + $0x18] sm:$0xff] %v566_v16  ;;  %v561_v18 = vadd.f32 %v651_v10, %v560_v17 }
 0x264   :  { %v828_v19 = vpop.f32.mrf.mxu0 }
 0x265   :  { %611 = vst [vmem:[#allocation2 + $0x10] sm:$0xff] %v561_v18  ;;  %v576_v20 = vadd.f32 %v828_v19, %v651_v10 }
 0x266   :  { %v570_v21 = vpop.f32.mrf.mxu0 }
 0x267   :  { %614 = vst [vmem:[#allocation2 + $0x28] sm:$0xff] %v576_v20  ;;  %v571_v22 = vadd.f32 %v651_v10, %v570_v21 }
 0x268   :  { %v831_v23 = vpop.f32.mrf.mxu0 }
 0x269   :  { %613 = vst [vmem:[#allocation2 + $0x20] sm:$0xff] %v571_v22  ;;  %v586_v24 = vadd.f32 %v831_v23, %v651_v10 }
 0x26a   :  { %v580_v25 = vpop.f32.mrf.mxu0 }
 0x26b   :  { %616 = vst [vmem:[#allocation2 + $0x38] sm:$0xff] %v586_v24  ;;  %v581_v26 = vadd.f32 %v651_v10, %v580_v25 }
 0x26c   :  { %v834_v27 = vpop.f32.mrf.mxu0 }
 0x26d   :  { %615 = vst [vmem:[#allocation2 + $0x30] sm:$0xff] %v581_v26  ;;  %v596_v28 = vadd.f32 %v834_v27, %v651_v10 }
 0x26e   :  { %v590_v29 = vpop.f32.mrf.mxu0 }
 0x26f   :  { %618 = vst [vmem:[#allocation2 + $0x48] sm:$0xff] %v596_v28  ;;  %v591_v30 = vadd.f32 %v651_v10, %v590_v29 }
 0x270   :  { %v837_v31 = vpop.f32.mrf.mxu0 }
 0x271   :  { %617 = vst [vmem:[#allocation2 + $0x40] sm:$0xff] %v591_v30  ;;  %v606_v32 = vadd.f32 %v837_v31, %v651_v10 }
 0x272   :  { %v600_v33 = vpop.f32.mrf.mxu0 }
 0x273   :  { %620 = vst [vmem:[#allocation2 + $0x58] sm:$0xff] %v606_v32  ;;  %v601_v34 = vadd.f32 %v651_v10, %v600_v33 }
 0x275   :  { %619 = vst [vmem:[#allocation2 + $0x50] sm:$0xff] %v601_v34 }
 0x276   :  { %852 = shalt.err (!%p849_p4)
}
 0x277   :  { %s864_s12 = smov 128   ;;  %s865_s13 = smov 8  }
 0x278   :  { %632 = dma.vmem_to_hbm [thread:$0]  %s627_s10, 1536, %s1069_s7, [#allocation3], %s864_s12, %s864_s12, %s865_s13  }
 0x279   :  { %861 = dma.done.wait [#allocation3], 1536  }
 0x27a   :  { %862 = vsyncadd [#allocation3], 4294965760 }
 0x27b   :  { %636 = vsyncpa [#allocation3], 1 }

</bundles_post_ra>
